<compile_context>
chip_gen: v6e
topology: v6e:2x2x1
jax: 0.10.0
libtpu: 0.0.40
codegen_flags: <defaults>
</compile_context>

<pallas_src>
import functools

import jax
import jax.numpy as jnp
from jax.experimental import pallas as pl
from jax.experimental.pallas import tpu as pltpu

BN_EPS = 1e-5

# Row layout of the single packed parameter array (all rows share lane width H):
#   rows [0, 8)                      : tiny per-feature vectors (padded to 8)
#   rows [8, 8+n_obs)                : W1  (n_obs, H)
#   rows [8+n_obs, 8+n_obs+H)        : W2 hidden part  (H, H)
#   rows [8+n_obs+H, 8+n_obs+H+A)    : W2 action part  (A, H)
_ROW_B1 = 0
_ROW_GAMMA = 1
_ROW_BETA = 2
_ROW_B2 = 3
_ROW_W3 = 4
_ROW_B3 = 5
_SMALL_ROWS = 8  # padded to a full sublane group


def critic_kernel(obs_ref, act_ref, par_ref, out_ref,
                  *, n_obs, n_hidden, n_actions):
    obs = obs_ref[...]            # (B, n_obs)
    act = act_ref[...]            # (B, n_actions)
    B = obs.shape[0]

    # Static rows of the packed small-parameter block.
    b1 = par_ref[_ROW_B1:_ROW_B1 + 1, :]          # (1, H)
    gamma = par_ref[_ROW_GAMMA:_ROW_GAMMA + 1, :]
    beta = par_ref[_ROW_BETA:_ROW_BETA + 1, :]
    b2 = par_ref[_ROW_B2:_ROW_B2 + 1, :]
    w3_row = par_ref[_ROW_W3:_ROW_W3 + 1, :]      # output weight as a row
    b3 = par_ref[_ROW_B3:_ROW_B3 + 1, 0:1]        # (1, 1)

    # Static, sublane-aligned slices of the packed weight stack.
    r0 = _SMALL_ROWS
    w1 = par_ref[r0:r0 + n_obs, :]                                       # (n_obs, H)
    w2o = par_ref[r0 + n_obs:r0 + n_obs + n_hidden, :]                   # (H, H)
    w2a = par_ref[r0 + n_obs + n_hidden:
                  r0 + n_obs + n_hidden + n_actions, :]                  # (A, H)

    # input_layer: obs @ W1 + b1  (MXU)
    h = jnp.dot(obs, w1, preferred_element_type=jnp.float32) + b1

    # BatchNorm1d (training-mode) statistics: XLU sublane reductions, two-pass
    # variance (numerically safe, and keeps the MXU off the critical path).
    inv_b = jnp.float32(1.0 / B)
    mean = jnp.sum(h, axis=0, keepdims=True) * inv_b
    c = h - mean
    var = jnp.sum(c * c, axis=0, keepdims=True) * inv_b   # biased variance
    scale = gamma * jax.lax.rsqrt(var + BN_EPS)            # EUP
    hn = jnp.maximum(c * scale + beta, 0.0)                # BN + ReLU (VPU)

    # hidden_layer on concat([hn, act], 1), expressed as a split matmul over
    # the two contiguous pieces of the packed W2.
    x = (jnp.dot(hn, w2o, preferred_element_type=jnp.float32)
         + jnp.dot(act, w2a, preferred_element_type=jnp.float32)
         + b2)
    x = jnp.maximum(x, 0.0)

    # output_layer (single output column): VPU multiply + XLU lane reduce.
    out_ref[...] = jnp.sum(x * w3_row, axis=-1, keepdims=True) + b3


def critic_forward(obs, action, params_packed):
    """obs: (B, n_obs) or (G, B, n_obs); action matching.  Returns (…, 1)."""
    squeeze = obs.ndim == 2
    if squeeze:
        obs = obs[None]
        action = action[None]
    G, B, n_obs = obs.shape
    n_actions = action.shape[-1]
    n_hidden = params_packed.shape[1]
    n_rows = _SMALL_ROWS + n_obs + n_hidden + n_actions
    assert params_packed.shape[0] == n_rows, (params_packed.shape, n_rows)
    # Packed-weight slicing relies on sublane-aligned static slice starts; the
    # lane reduce of w3_row assumes a single-vreg lane width.
    assert n_obs % 8 == 0 and n_hidden % 8 == 0, (
        "packed-weight slicing requires n_obs and n_hidden to be multiples of 8")
    assert n_hidden <= 128, "w3 lane-reduce layout assumes n_hidden <= 128"
    # n_actions need not be 8-aligned: the w2a slice starts on an aligned row
    # and ends at the (padded) tail of the packed array.

    kernel = functools.partial(critic_kernel,
                               n_obs=n_obs, n_hidden=n_hidden,
                               n_actions=n_actions)
    out = pl.pallas_call(
        kernel,
        out_shape=jax.ShapeDtypeStruct((G, B, 1), jnp.float32),
        grid=(G,),
        in_specs=[
            pl.BlockSpec((None, B, n_obs), lambda g: (g, 0, 0)),
            pl.BlockSpec((None, B, n_actions), lambda g: (g, 0, 0)),
            pl.BlockSpec((n_rows, n_hidden), lambda g: (0, 0)),  # resident
        ],
        out_specs=pl.BlockSpec((None, B, 1), lambda g: (g, 0, 0)),
        compiler_params=pltpu.CompilerParams(
            dimension_semantics=("parallel",)),
    )(obs, action, params_packed)
    return out[0] if squeeze else out


def init_params(key, n_obs, n_hidden, n_actions):
    """Deterministic synthetic params (torch-Linear-style uniform init),
    stored pre-transposed so the kernel computes x @ W + b."""
    ks = jax.random.split(key, 6)

    def unif(k, shape, fan_in):
        bound = 1.0 / jnp.sqrt(jnp.float32(fan_in))
        return jax.random.uniform(k, shape, jnp.float32, -bound, bound)

    fan2 = n_hidden + n_actions
    return dict(
        w1=unif(ks[0], (n_obs, n_hidden), n_obs),          # (n_obs, H)
        b1=unif(ks[1], (n_hidden,), n_obs),
        gamma=jnp.ones((n_hidden,), jnp.float32),
        beta=jnp.zeros((n_hidden,), jnp.float32),
        w2=unif(ks[2], (fan2, n_hidden), fan2),             # (H + A, H)
        b2=unif(ks[3], (n_hidden,), fan2),
        w3=unif(ks[4], (n_hidden,), n_hidden),              # output weight row
        b3=unif(ks[5], (1,), n_hidden),
    )


def pack_params(p, n_hidden):
    """Pack everything into ONE (8 + n_obs + H + A, H) array."""
    small = jnp.stack([
        p["b1"],
        p["gamma"],
        p["beta"],
        p["b2"],
        p["w3"],
        jnp.broadcast_to(p["b3"], (n_hidden,)),
        jnp.zeros((n_hidden,), jnp.float32),
        jnp.zeros((n_hidden,), jnp.float32),
    ], axis=0)                                              # (8, H)
    return jnp.concatenate([small, p["w1"], p["w2"]], axis=0)


def critic_reference(obs, action, p):
    """Pure-JAX reference mirroring the PyTorch forward (training-mode BN)."""
    h = obs @ p["w1"] + p["b1"][None, :]
    mean = jnp.mean(h, axis=0, keepdims=True)
    var = jnp.mean((h - mean) ** 2, axis=0, keepdims=True)
    hn = (h - mean) / jnp.sqrt(var + BN_EPS) * p["gamma"] + p["beta"]
    hn = jnp.maximum(hn, 0.0)
    x = jnp.concatenate([hn, action], axis=1)
    x = jnp.maximum(x @ p["w2"] + p["b2"], 0.0)
    return x @ p["w3"][:, None] + p["b3"]


if __name__ == "__main__":
    # Two independent minibatches (e.g. critic eval on two replay batches)
    # processed in one pallas_call; BN stats are per-minibatch as in PyTorch.
    G, B, N_OBS, N_HIDDEN, N_ACTIONS = 2, 64, 16, 32, 8

    key = jax.random.PRNGKey(0)
    k_obs, k_act, k_par = jax.random.split(key, 3)
    obs = jax.random.normal(k_obs, (G, B, N_OBS), jnp.float32)
    action = jax.random.normal(k_act, (G, B, N_ACTIONS), jnp.float32)
    params = init_params(k_par, N_OBS, N_HIDDEN, N_ACTIONS)
    params_packed = pack_params(params, N_HIDDEN)

    # Batched (grid) path.
    out = critic_forward(obs, action, params_packed)
    out = jax.block_until_ready(out)
    ref = jax.vmap(lambda o, a: critic_reference(o, a, params))(obs, action)
    assert out.shape == (G, B, 1), out.shape
    assert jnp.allclose(out, ref, atol=1e-4, rtol=1e-4), (out, ref)

    # Single-minibatch (module-signature) path.
    out2 = critic_forward(obs[0], action[0], params_packed)
    out2 = jax.block_until_ready(out2)
    assert out2.shape == (B, 1), out2.shape
    assert jnp.allclose(out2, ref[0], atol=1e-4, rtol=1e-4), (out2, ref[0])

    print("KERNEL_OK")
</pallas_src>

<mosaic_0001>
module attributes {stable_mosaic.version = 11 : i64} {
  func.func @critic_kernel(%arg0: i32, %arg1: memref<1x64x16xf32, #tpu.memory_space<vmem>>, %arg2: memref<1x64x8xf32, #tpu.memory_space<vmem>>, %arg3: memref<64x32xf32, #tpu.memory_space<vmem>>, %arg4: memref<1x64x1xf32, #tpu.memory_space<vmem>>) attributes {dimension_semantics = [#tpu.dimension_semantics<parallel>], iteration_bounds = array<i64: 2>, scalar_prefetch = 0 : i64, scratch_operands = 0 : i64, tpu.core_type = #tpu.core_type<tc>, window_params = [{transform_indices = @transform_0, window_bounds = array<i64: 1, 64, 16>}, {transform_indices = @transform_1, window_bounds = array<i64: 1, 64, 8>}, {pipeline_mode = #tpu.pipeline_mode<synchronous>, transform_indices = @transform_2, window_bounds = array<i64: 64, 32>}, {transform_indices = @transform_3, window_bounds = array<i64: 1, 64, 1>}]} {
    %c0 = arith.constant 0 : index
    %c0_0 = arith.constant 0 : index
    %c0_1 = arith.constant 0 : index
    %0 = vector.load %arg1[%c0, %c0_0, %c0_1] : memref<1x64x16xf32, #tpu.memory_space<vmem>>, vector<1x64x16xf32>
    %1 = vector.shape_cast %0 : vector<1x64x16xf32> to vector<64x16xf32>
    %c0_2 = arith.constant 0 : index
    %c0_3 = arith.constant 0 : index
    %c0_4 = arith.constant 0 : index
    %2 = vector.load %arg2[%c0_2, %c0_3, %c0_4] : memref<1x64x8xf32, #tpu.memory_space<vmem>>, vector<1x64x8xf32>
    %3 = vector.shape_cast %2 : vector<1x64x8xf32> to vector<64x8xf32>
    %c0_5 = arith.constant 0 : index
    %c0_6 = arith.constant 0 : index
    %4 = vector.load %arg3[%c0_5, %c0_6] : memref<64x32xf32, #tpu.memory_space<vmem>>, vector<1x32xf32>
    %c1 = arith.constant 1 : index
    %c0_7 = arith.constant 0 : index
    %5 = vector.load %arg3[%c1, %c0_7] : memref<64x32xf32, #tpu.memory_space<vmem>>, vector<1x32xf32>
    %c2 = arith.constant 2 : index
    %c0_8 = arith.constant 0 : index
    %6 = vector.load %arg3[%c2, %c0_8] : memref<64x32xf32, #tpu.memory_space<vmem>>, vector<1x32xf32>
    %c3 = arith.constant 3 : index
    %c0_9 = arith.constant 0 : index
    %7 = vector.load %arg3[%c3, %c0_9] : memref<64x32xf32, #tpu.memory_space<vmem>>, vector<1x32xf32>
    %c4 = arith.constant 4 : index
    %c0_10 = arith.constant 0 : index
    %8 = vector.load %arg3[%c4, %c0_10] : memref<64x32xf32, #tpu.memory_space<vmem>>, vector<1x32xf32>
    %c5 = arith.constant 5 : index
    %c0_11 = arith.constant 0 : index
    %9 = vector.load %arg3[%c5, %c0_11] : memref<64x32xf32, #tpu.memory_space<vmem>>, vector<1x1xf32>
    %c8 = arith.constant 8 : index
    %c0_12 = arith.constant 0 : index
    %10 = vector.load %arg3[%c8, %c0_12] : memref<64x32xf32, #tpu.memory_space<vmem>>, vector<16x32xf32>
    %c24 = arith.constant 24 : index
    %c0_13 = arith.constant 0 : index
    %11 = vector.load %arg3[%c24, %c0_13] : memref<64x32xf32, #tpu.memory_space<vmem>>, vector<32x32xf32>
    %c56 = arith.constant 56 : index
    %c0_14 = arith.constant 0 : index
    %12 = vector.load %arg3[%c56, %c0_14] : memref<64x32xf32, #tpu.memory_space<vmem>>, vector<8x32xf32>
    %cst = arith.constant dense<0.000000e+00> : vector<64x32xf32>
    %13 = tpu.matmul %1, %10, %cst {dimension_numbers = #tpu.dot_dimension_numbers<[1], [0], [0], [1], [0, 0, 1, 1], [], []>} : vector<64x16xf32>, vector<16x32xf32>, vector<64x32xf32> -> vector<64x32xf32>
    %14 = vector.broadcast %4 : vector<1x32xf32> to vector<64x32xf32>
    %15 = arith.addf %13, %14 : vector<64x32xf32>
    %cst_15 = arith.constant dense<0.000000e+00> : vector<32xf32>
    %16 = vector.multi_reduction <add>, %15, %cst_15 [0] : vector<64x32xf32> to vector<32xf32>
    %17 = vector.shape_cast %16 : vector<32xf32> to vector<1x32xf32>
    %cst_16 = arith.constant 1.562500e-02 : f32
    %18 = vector.broadcast %cst_16 : f32 to vector<1x32xf32>
    %19 = arith.mulf %17, %18 : vector<1x32xf32>
    %20 = vector.broadcast %19 : vector<1x32xf32> to vector<64x32xf32>
    %21 = arith.subf %15, %20 : vector<64x32xf32>
    %22 = arith.mulf %21, %21 : vector<64x32xf32>
    %cst_17 = arith.constant dense<0.000000e+00> : vector<32xf32>
    %23 = vector.multi_reduction <add>, %22, %cst_17 [0] : vector<64x32xf32> to vector<32xf32>
    %24 = vector.shape_cast %23 : vector<32xf32> to vector<1x32xf32>
    %cst_18 = arith.constant 1.562500e-02 : f32
    %25 = vector.broadcast %cst_18 : f32 to vector<1x32xf32>
    %26 = arith.mulf %24, %25 : vector<1x32xf32>
    %cst_19 = arith.constant 9.99999974E-6 : f32
    %27 = vector.broadcast %cst_19 : f32 to vector<1x32xf32>
    %28 = arith.addf %26, %27 : vector<1x32xf32>
    %29 = math.rsqrt %28 : vector<1x32xf32>
    %30 = arith.mulf %5, %29 : vector<1x32xf32>
    %31 = vector.broadcast %30 : vector<1x32xf32> to vector<64x32xf32>
    %32 = arith.mulf %21, %31 : vector<64x32xf32>
    %33 = vector.broadcast %6 : vector<1x32xf32> to vector<64x32xf32>
    %34 = arith.addf %32, %33 : vector<64x32xf32>
    %cst_20 = arith.constant 0.000000e+00 : f32
    %35 = vector.broadcast %cst_20 : f32 to vector<64x32xf32>
    %36 = arith.maximumf %34, %35 : vector<64x32xf32>
    %cst_21 = arith.constant dense<0.000000e+00> : vector<64x32xf32>
    %37 = tpu.matmul %36, %11, %cst_21 {dimension_numbers = #tpu.dot_dimension_numbers<[1], [0], [0], [1], [0, 0, 1, 1], [], []>} : vector<64x32xf32>, vector<32x32xf32>, vector<64x32xf32> -> vector<64x32xf32>
    %cst_22 = arith.constant dense<0.000000e+00> : vector<64x32xf32>
    %38 = tpu.matmul %3, %12, %cst_22 {dimension_numbers = #tpu.dot_dimension_numbers<[1], [0], [0], [1], [0, 0, 1, 1], [], []>} : vector<64x8xf32>, vector<8x32xf32>, vector<64x32xf32> -> vector<64x32xf32>
    %39 = arith.addf %37, %38 : vector<64x32xf32>
    %40 = vector.broadcast %7 : vector<1x32xf32> to vector<64x32xf32>
    %41 = arith.addf %39, %40 : vector<64x32xf32>
    %cst_23 = arith.constant 0.000000e+00 : f32
    %42 = vector.broadcast %cst_23 : f32 to vector<64x32xf32>
    %43 = arith.maximumf %41, %42 : vector<64x32xf32>
    %44 = vector.broadcast %8 : vector<1x32xf32> to vector<64x32xf32>
    %45 = arith.mulf %43, %44 : vector<64x32xf32>
    %cst_24 = arith.constant dense<0.000000e+00> : vector<64xf32>
    %46 = vector.multi_reduction <add>, %45, %cst_24 [1] : vector<64x32xf32> to vector<64xf32>
    %47 = vector.shape_cast %46 : vector<64xf32> to vector<64x1xf32>
    %48 = vector.broadcast %9 : vector<1x1xf32> to vector<64x1xf32>
    %49 = arith.addf %47, %48 : vector<64x1xf32>
    %c0_25 = arith.constant 0 : index
    %c0_26 = arith.constant 0 : index
    %c0_27 = arith.constant 0 : index
    %50 = vector.load %arg4[%c0_25, %c0_26, %c0_27] : memref<1x64x1xf32, #tpu.memory_space<vmem>>, vector<1x64x1xf32>
    %51 = vector.shape_cast %50 : vector<1x64x1xf32> to vector<64x1xf32>
    %52 = vector.shape_cast %49 : vector<64x1xf32> to vector<1x64x1xf32>
    tpu.vector_store %arg4[%c0_25, %c0_26, %c0_27], %52 {strides = array<i32>} : memref<1x64x1xf32, #tpu.memory_space<vmem>>, vector<1x64x1xf32>,
    return
  }
  func.func @transform_0(%arg0: i32) -> (i32, i32, i32) {
    %c0_i32 = arith.constant 0 : i32
    %c0_i32_0 = arith.constant 0 : i32
    %c0_i32_1 = arith.constant 0 : i32
    return %arg0, %c0_i32, %c0_i32_0 : i32, i32, i32
  }
  func.func @transform_1(%arg0: i32) -> (i32, i32, i32) {
    %c0_i32 = arith.constant 0 : i32
    %c0_i32_0 = arith.constant 0 : i32
    %c0_i32_1 = arith.constant 0 : i32
    return %arg0, %c0_i32, %c0_i32_0 : i32, i32, i32
  }
  func.func @transform_2(%arg0: i32) -> (i32, i32) {
    %c0_i32 = arith.constant 0 : i32
    %c0_i32_0 = arith.constant 0 : i32
    %c0_i32_1 = arith.constant 0 : i32
    return %c0_i32, %c0_i32_0 : i32, i32
  }
  func.func @transform_3(%arg0: i32) -> (i32, i32, i32) {
    %c0_i32 = arith.constant 0 : i32
    %c0_i32_0 = arith.constant 0 : i32
    %c0_i32_1 = arith.constant 0 : i32
    return %arg0, %c0_i32, %c0_i32_0 : i32, i32, i32
  }
}

</mosaic_0001>

<bundles_post_ra>
// kernel: tpu_custom_call.1
= control target key start
LH: loop header
LB: loop body
LE: loop exit
PB: predicated region body
PF: predicated region fallthrough
CT: control target
= control target key end

     0   :  { %s1019_s12 = smov 0   ;;  %s1149_s0 = inlined_call_operand.vmem [shape: f32[2,64,16], index: 0, kind: input, shape index: {}]   ;;  %s1150_s1 = inlined_call_operand.vmem [shape: f32[2,64,8], index: 1, kind: input, shape index: {}]   ;;  %s1151_s2 = inlined_call_operand.vmem [shape: f32[64,32], index: 2, kind: input, shape index: {}]   ;;  %s1152_s3 = inlined_call_operand.vmem [shape: f32[2,64,1], index: 3, kind: output, shape index: {}]  }
   0x1 LB: > { %s853_s13 = sadd.s32 4294967295, %s997_s12   ;;  %p857_p0 = scmp.ge.s32.totalorder %s997_s12, 1  ;;  %s997_s12 = sphi %s1019_s12, %s13_s12  }
   0x2   : > { %p147_p1 = scmp.lt.s32.totalorder %s997_s12, 3 }
   0x4   : > { %p148_p2 = pnand %p857_p0, %p147_p1 }
   0x5   : > { %p176_p3 = scmp.lt.s32.totalorder (!%p148_p2), %s853_s13, 1 }
   0x6   : > { %151 = sbr.rel (%p148_p2) target bundleno = 663 (0x297), region = 32 }
   0xb   : > { %v214_v0 = vld [vmem:[%s1151_s2 + $0x10] sm:$0xff]  ;;  %v213_v1 = vld [vmem:[%s1151_s2 + $0x8] sm:$0xff]  ;;  %s1154_s13 = smov (!%p176_p3, %s853_s13), 1  ;;  %vm224_vm0 = vcmask 130048   ;;  %v219_v10 = vld [vmem:[%s1151_s2 + $0x38] sm:$0xff]  ;;  %vm450_vm1 = vcmask 64512  }
   0xc   : > { %929 = vmatprep.subr.mxu0 %v214_v0  ;;  %s1033_s18 = sshll.u32 %s1154_s13, 6  ;;  %979 = vmatprep.subr.mxu1 %v219_v10  ;;  %v218_v13 = vld [vmem:[%s1151_s2 + $0x30] sm:$0xff]  ;;  %v217_v15 = vld [vmem:[%s1151_s2 + $0x28] sm:$0xff]  ;;  %v216_v17 = vld [vmem:[%s1151_s2 + $0x20] sm:$0xff]  ;;  %vm354_vm2 = vcmask 261120   ;;  %vm777_vm3 = vcmask 7168  }
   0xd   : > { %930 = vmatpush3.msra.mxu0 %v214_v0  ;;  %s180_s21 = scalar_lea.vmem %s1149_s0, %s1033_s18  ;;  %s1054_s26 = scalar_lea.vmem %s1150_s1, %s1033_s18  ;;  %980 = vmatpush3.msra.mxu1 %v219_v10  ;;  %v215_v19 = vld [vmem:[%s1151_s2 + $0x18] sm:$0xff]  ;;  %v864_v24 = vld [vmem:[%s1151_s2] ss:$0 sm:$0xff] }
   0xe   : > { %931 = vmatprep.subr.mxu0 %v213_v1  ;;  %v191_v2 = vld [vmem:[%s180_s21] sm:$0xff]  ;;  %v192_v3 = vld [vmem:[%s180_s21 + $0x8] sm:$0xff]  ;;  %v193_v4 = vld [vmem:[%s180_s21 + $0x10] sm:$0xff]  ;;  %959 = vmatprep.subr.mxu1 %v218_v13  ;;  %s190_s24 = scalar_lea.vmem %s1152_s3, %s1033_s18 }
   0xf   : > { %932 = vmatpush3.msra.mxu0 %v213_v1  ;;  %933 = vmatprep.mubr.msk.f32.mxu0 %vm224_vm0, %v191_v2  ;;  %v194_v5 = vld [vmem:[%s180_s21 + $0x18] sm:$0xff]  ;;  %v195_v6 = vld [vmem:[%s180_s21 + $0x20] sm:$0xff]  ;;  %v196_v7 = vld [vmem:[%s180_s21 + $0x28] sm:$0xff] }
  0x10   : > { %934 = vmatmul.mubr.msk.f32.vlgmr.msra.gmra.mxu0 %vm224_vm0, %v192_v3  ;;  %v197_v8 = vld [vmem:[%s180_s21 + $0x30] sm:$0xff]  ;;  %v198_v9 = vld [vmem:[%s180_s21 + $0x38] sm:$0xff]  ;;  %945 = vmatprep.subr.mxu0 %v219_v10  ;;  %v203_v11 = vld [vmem:[%s1054_s26 + $0x20] sm:$0xff] }
  0x11   : > { %936 = vmatprep.mubr.msk.f32.mxu0 %vm224_vm0, %v193_v4  ;;  %946 = vmatpush3.msra.mxu0 %v219_v10  ;;  %v204_v12 = vld [vmem:[%s1054_s26 + $0x28] sm:$0xff]  ;;  %v205_v14 = vld [vmem:[%s1054_s26 + $0x30] sm:$0xff]  ;;  %v206_v16 = vld [vmem:[%s1054_s26 + $0x38] sm:$0xff] }
  0x12   : > { %953 = vmatprep.mubr.msk.f32.mxu1 %vm450_vm1, %v203_v11  ;;  %v199_v18 = vld [vmem:[%s1054_s26] sm:$0xff]  ;;  %v200_v20 = vld [vmem:[%s1054_s26 + $0x8] sm:$0xff]  ;;  %v201_v21 = vld [vmem:[%s1054_s26 + $0x10] sm:$0xff] }
  0x13   : > { %954 = vmatmul.mubr.msk.f32.vlgmr.msra.gmra.mxu1 %vm450_vm1, %v204_v12  ;;  %v202_v22 = vld [vmem:[%s1054_s26 + $0x18] sm:$0xff] }
  0x14   : > { %937 = vmatmul.mubr.msk.f32.gmra.mxu0 %vm224_vm0, %v194_v5  ;;  %960 = vmatpush3.msra.mxu1 %v218_v13 }
  0x15   : > { %939 = vmatprep.mubr.msk.f32.mxu0 %vm224_vm0, %v195_v6  ;;  %956 = vmatprep.mubr.msk.f32.mxu1 %vm450_vm1, %v205_v14 }
  0x16   : > { %961 = vmatprep.subr.mxu1 %v217_v15 }
  0x17   : > { %957 = vmatmul.mubr.msk.f32.gmra.mxu1 %vm450_vm1, %v206_v16 }
  0x18   : > { %940 = vmatmul.mubr.msk.f32.gmra.mxu0 %vm224_vm0, %v196_v7  ;;  %962 = vmatpush3.msra.mxu1 %v217_v15 }
  0x19   : > { %942 = vmatprep.mubr.msk.f32.mxu0 %vm224_vm0, %v197_v8  ;;  %963 = vmatprep.subr.mxu1 %v216_v17 }
  0x1a   : > { %964 = vmatpush3.msra.mxu1 %v216_v17 }
  0x1b   : > { %965 = vmatprep.subr.mxu1 %v215_v19 }
  0x1c   : > { %943 = vmatmul.mubr.msk.f32.gmra.mxu0 %vm224_vm0, %v198_v9  ;;  %966 = vmatpush3.msra.mxu1 %v215_v19 }
  0x1d   : > { %947 = vmatprep.mubr.msk.f32.mxu0 %vm450_vm1, %v199_v18 }
  0x20   : > { %948 = vmatmul.mubr.msk.f32.vlgmr.msra.gmra.mxu0 %vm450_vm1, %v200_v20 }
  0x21   : > { %950 = vmatprep.mubr.msk.f32.mxu0 %vm450_vm1, %v201_v21 }
  0x24   : > { %951 = vmatmul.mubr.msk.f32.gmra.mxu0 %vm450_vm1, %v202_v22 }
  0xd0   : > { %v935_v23 = vpop.f32.mrf.mxu0 }
  0xd1   : > { %v321_v26 = vadd.f32 %v935_v23, %v864_v24 }
  0xd2   : > { %v315_v25 = vpop.f32.mrf.mxu0 }
  0xd3   : > { %v316_v27 = vadd.f32 %v864_v24, %v315_v25  ;;  %v356_v31 = vsel %vm354_vm2, %v321_v26, 0.0 }
  0xd4   : > { %v938_v28 = vpop.f32.mrf.mxu0 }
  0xd5   : > { %v355_v29 = vsel %vm354_vm2, %v316_v27, 0.0  ;;  %v331_v32 = vadd.f32 %v938_v28, %v864_v24 }
  0xd6   : > { %v325_v30 = vpop.f32.mrf.mxu0  ;;  %v357_v34 = vadd.f32 %v356_v31, %v355_v29 }
  0xd7   : > { %v326_v33 = vadd.f32 %v864_v24, %v325_v30  ;;  %v360_v39 = vsel %vm354_vm2, %v331_v32, 0.0 }
  0xd8   : > { %v941_v35 = vpop.f32.mrf.mxu0 }
  0xd9   : > { %v358_v36 = vsel %vm354_vm2, %v326_v33, 0.0  ;;  %v341_v40 = vadd.f32 %v941_v35, %v864_v24 }
  0xda   : > { %v359_v37 = vadd.f32 %v358_v36, %v357_v34  ;;  %v335_v38 = vpop.f32.mrf.mxu0 }
  0xdb   : > { %v336_v41 = vadd.f32 %v864_v24, %v335_v38  ;;  %v364_v47 = vsel %vm354_vm2, %v341_v40, 0.0 }
  0xdc   : > { %v361_v42 = vadd.f32 %v360_v39, %v359_v37  ;;  %v944_v43 = vpop.f32.mrf.mxu0  ;;  %v418_v37 = vlaneseq  ;;  %v208_v39 = vld [vmem:[%s1151_s2 + $0x1] sm:$0x1] }
  0xdd   : > { %v362_v44 = vsel %vm354_vm2, %v336_v41, 0.0  ;;  %v351_v48 = vadd.f32 %v944_v43, %v864_v24 }
  0xde   : > { %v363_v45 = vadd.f32 %v362_v44, %v361_v42  ;;  %v345_v46 = vpop.f32.mrf.mxu0  ;;  %v419_v38 = vshrl.u32 %v418_v37, 7  ;;  %v873_v44 = vld [vmem:[%s1151_s2 + $0x2] ss:$0 sm:$0xff] }
  0xdf   : > { %v346_v49 = vadd.f32 %v864_v24, %v345_v46  ;;  %v368_v53 = vsel %vm354_vm2, %v351_v48, 0.0 }
  0xe0   : > { %v365_v50 = vadd.f32 %v364_v47, %v363_v45 }
  0xe1   : > { %v366_v51 = vsel %vm354_vm2, %v346_v49, 0.0 }
  0xe2   : > { %v367_v52 = vadd.f32 %v366_v51, %v365_v50 }
  0xe4   : > { %v369_v54 = vadd.f32 %v368_v53, %v367_v52 }
  0xe6   : > { %v370_v55 = vrot.slane %v369_v54, 4 }
  0xe8   : > { %v371_v56 = vadd.f32 %v370_v55, %v369_v54 }
  0xea   : > { %v372_v57 = vrot.slane %v371_v56, 2 }
  0xec   : > { %v373_v58 = vadd.f32 %v372_v57, %v371_v56 }
  0xee   : > { %v374_v59 = vrot.slane %v373_v58, 1 }
  0xf0   : > { %v375_v60 = vadd.f32 %v374_v59, %v373_v58 }
  0xf2   : > { %v376_v61 = vmul.f32 0.015625, %v375_v60 }
  0xf4   : > { %v377_v62 = vsub.f32 %v316_v27, %v376_v61  ;;  %v378_v63 = vsub.f32 %v321_v26, %v376_v61  ;;  %v379_v0 = vsub.f32 %v326_v33, %v376_v61  ;;  %v380_v1 = vsub.f32 %v331_v32, %v376_v61 }
  0xf5   : > { %v381_v2 = vsub.f32 %v336_v41, %v376_v61  ;;  %v382_v6 = vsub.f32 %v341_v40, %v376_v61  ;;  %v383_v11 = vsub.f32 %v346_v49, %v376_v61  ;;  %v384_v15 = vsub.f32 %v351_v48, %v376_v61 }
  0xf6   : > { %v385_v3 = vmul.f32 %v377_v62, %v377_v62  ;;  %v386_v4 = vmul.f32 %v378_v63, %v378_v63  ;;  %v387_v5 = vmul.f32 %v379_v0, %v379_v0  ;;  %v388_v7 = vmul.f32 %v380_v1, %v380_v1 }
  0xf7   : > { %v389_v12 = vmul.f32 %v381_v2, %v381_v2  ;;  %v390_v16 = vmul.f32 %v382_v6, %v382_v6  ;;  %v391_v19 = vmul.f32 %v383_v11, %v383_v11  ;;  %v392_v22 = vmul.f32 %v384_v15, %v384_v15 }
  0xf8   : > { %v393_v8 = vsel %vm354_vm2, %v385_v3, 0.0  ;;  %v394_v9 = vsel %vm354_vm2, %v386_v4, 0.0  ;;  %v396_v13 = vsel %vm354_vm2, %v387_v5, 0.0  ;;  %v398_v17 = vsel %vm354_vm2, %v388_v7, 0.0  ;;  %v955_v5 = vpop.f32.mrf.mxu1 }
  0xf9   : > { %v395_v10 = vadd.f32 %v394_v9, %v393_v8  ;;  %v400_v20 = vsel %vm354_vm2, %v389_v12, 0.0  ;;  %v402_v23 = vsel %vm354_vm2, %v390_v16, 0.0  ;;  %v404_v25 = vsel %vm354_vm2, %v391_v19, 0.0  ;;  %v949_v8 = vpop.f32.mrf.mxu0  ;;  %v891_v19 = vld [vmem:[%s1151_s2 + $0x4] ss:$0 sm:$0xff] }
  0xfa   : > { %v406_v27 = vsel %vm354_vm2, %v392_v22, 0.0  ;;  %v420_v40 = vsub.s32 0, %v419_v38 }
  0xfb   : > { %v397_v14 = vadd.f32 %v396_v13, %v395_v10  ;;  %v541_v10 = vpop.f32.mrf.mxu0 }
  0xfd   : > { %v399_v18 = vadd.f32 %v398_v17, %v397_v14  ;;  %v952_v14 = vpop.f32.mrf.mxu0 }
  0xff   : > { %v401_v21 = vadd.f32 %v400_v20, %v399_v18 }
 0x101   : > { %v403_v24 = vadd.f32 %v402_v23, %v401_v21  ;;  %v551_v23 = vpop.f32.mrf.mxu0 }
 0x103   : > { %v405_v26 = vadd.f32 %v404_v25, %v403_v24 }
 0x105   : > { %v407_v28 = vadd.f32 %v406_v27, %v405_v26 }
 0x107   : > { %v408_v29 = vrot.slane %v407_v28, 4 }
 0x109   : > { %v409_v30 = vadd.f32 %v408_v29, %v407_v28 }
 0x10b   : > { %v410_v31 = vrot.slane %v409_v30, 2 }
 0x10d   : > { %v411_v32 = vadd.f32 %v410_v31, %v409_v30 }
 0x10f   : > { %v412_v33 = vrot.slane %v411_v32, 1 }
 0x111   : > { %v413_v34 = vadd.f32 %v412_v33, %v411_v32 }
 0x113   : > { %v414_v35 = vmul.f32 0.015625, %v413_v34 }
 0x115   : > { %v415_v36 = vadd.f32 1e-05, %v414_v35 }
 0x117   : > { %989 = vrsqrt.f32 %v415_v36 }
 0x124   : > { %v990_v41 = vpop.eup %989 }
 0x125   : > { %v417_v42 = vmul.f32 %v990_v41, %v208_v39 }
 0x127   : > { %v421_v43 = vrot.slane %v417_v42, %v420_v40 }
 0x129   : > { %v422_v45 = vmul.f32 %v421_v43, %v377_v62  ;;  %v423_v46 = vmul.f32 %v421_v43, %v378_v63  ;;  %v424_v47 = vmul.f32 %v421_v43, %v379_v0  ;;  %v425_v48 = vmul.f32 %v421_v43, %v380_v1 }
 0x12a   : > { %v426_v52 = vmul.f32 %v421_v43, %v381_v2  ;;  %v427_v56 = vmul.f32 %v421_v43, %v382_v6  ;;  %v428_v57 = vmul.f32 %v421_v43, %v383_v11  ;;  %v429_v62 = vmul.f32 %v421_v43, %v384_v15  ;;  %v561_v6 = vpop.f32.mrf.mxu1  ;;  %v890_v11 = vld [vmem:[%s1151_s2 + $0x3] ss:$0 sm:$0xff] }
 0x12b   : > { %v434_v49 = vadd.f32 %v873_v44, %v422_v45  ;;  %v435_v50 = vadd.f32 %v873_v44, %v423_v46  ;;  %v436_v51 = vadd.f32 %v873_v44, %v424_v47  ;;  %v437_v55 = vadd.f32 %v873_v44, %v425_v48 }
 0x12c   : > { %v438_v59 = vadd.f32 %v873_v44, %v426_v52  ;;  %v439_v61 = vadd.f32 %v873_v44, %v427_v56  ;;  %v440_v63 = vadd.f32 %v873_v44, %v428_v57  ;;  %v441_v2 = vadd.f32 %v873_v44, %v429_v62  ;;  %v958_v7 = vpop.f32.mrf.mxu1 }
 0x12d   : > { %v442_v53 = vmax.f32 %v434_v49, 0.0  ;;  %v443_v54 = vmax.f32 %v435_v50, 0.0  ;;  %v444_v58 = vmax.f32 %v436_v51, 0.0  ;;  %v445_v60 = vmax.f32 %v437_v55, 0.0 }
 0x12e   : > { %v446_v0 = vmax.f32 %v438_v59, 0.0  ;;  %v447_v1 = vmax.f32 %v439_v61, 0.0  ;;  %v448_v3 = vmax.f32 %v440_v63, 0.0  ;;  %v449_v4 = vmax.f32 %v441_v2, 0.0  ;;  %v571_v9 = vpop.f32.mrf.mxu1  ;;  %v892_v63 = vld [vmem:[%s1151_s2 + $0x5] ss:$0 sm:$0xff] }
 0x12f   : > { %967 = vmatprep.mubr.msk.f32.mxu1 %vm354_vm2, %v442_v53 }
 0x130   : > { %968 = vmatmul.mubr.msk.f32.vlgmr.msra.gmra.mxu1 %vm354_vm2, %v443_v54 }
 0x131   : > { %970 = vmatprep.mubr.msk.f32.mxu1 %vm354_vm2, %v444_v58 }
 0x134   : > { %971 = vmatmul.mubr.msk.f32.gmra.mxu1 %vm354_vm2, %v445_v60 }
 0x135   : > { %973 = vmatprep.mubr.msk.f32.mxu1 %vm354_vm2, %v446_v0 }
 0x138   : > { %974 = vmatmul.mubr.msk.f32.gmra.mxu1 %vm354_vm2, %v447_v1 }
 0x139   : > { %976 = vmatprep.mubr.msk.f32.mxu1 %vm354_vm2, %v448_v3 }
 0x13c   : > { %977 = vmatmul.mubr.msk.f32.gmra.mxu1 %vm354_vm2, %v449_v4 }
 0x1f0   : > { %v969_v12 = vpop.f32.mrf.mxu1 }
 0x1f1   : > { %v676_v13 = vadd.f32 %v969_v12, %v949_v8 }
 0x1f2   : > { %v670_v15 = vpop.f32.mrf.mxu1 }
 0x1f3   : > { %v714_v16 = vadd.f32 %v890_v11, %v676_v13  ;;  %v671_v17 = vadd.f32 %v670_v15, %v541_v10 }
 0x1f4   : > { %v972_v18 = vpop.f32.mrf.mxu1 }
 0x1f5   : > { %v722_v20 = vmax.f32 %v714_v16, 0.0  ;;  %v713_v21 = vadd.f32 %v890_v11, %v671_v17  ;;  %v686_v22 = vadd.f32 %v972_v18, %v952_v14 }
 0x1f6   : > { %v680_v24 = vpop.f32.mrf.mxu1 }
 0x1f7   : > { %v721_v25 = vmax.f32 %v713_v21, 0.0  ;;  %v716_v26 = vadd.f32 %v890_v11, %v686_v22  ;;  %v681_v27 = vadd.f32 %v680_v24, %v551_v23  ;;  %v734_v28 = vmul.f32 %v891_v19, %v722_v20 }
 0x1f8   : > { %v975_v29 = vpop.f32.mrf.mxu1 }
 0x1f9   : > { %v724_v30 = vmax.f32 %v716_v26, 0.0  ;;  %v715_v31 = vadd.f32 %v890_v11, %v681_v27  ;;  %v696_v32 = vadd.f32 %v975_v29, %v955_v5  ;;  %v744_v33 = vsel %vm354_vm2, %v734_v28, 0.0 }
 0x1fa   : > { %745 = vadd.xlane.f32.xlu0 %v744_v33  ;;  %v690_v34 = vpop.f32.mrf.mxu1  ;;  %v733_v35 = vmul.f32 %v891_v19, %v721_v25 }
 0x1fb   : > { %v723_v36 = vmax.f32 %v715_v31, 0.0  ;;  %v718_v37 = vadd.f32 %v890_v11, %v696_v32  ;;  %v691_v38 = vadd.f32 %v690_v34, %v561_v6  ;;  %v736_v39 = vmul.f32 %v891_v19, %v724_v30 }
 0x1fc   : > { %v978_v40 = vpop.f32.mrf.mxu1  ;;  %v741_v41 = vsel %vm354_vm2, %v733_v35, 0.0 }
 0x1fd   : > { %v726_v42 = vmax.f32 %v718_v37, 0.0  ;;  %v717_v43 = vadd.f32 %v890_v11, %v691_v38  ;;  %v706_v44 = vadd.f32 %v978_v40, %v958_v7  ;;  %v750_v45 = vsel %vm354_vm2, %v736_v39, 0.0 }
 0x1fe   : > { %751 = vadd.xlane.f32.xlu1 %v750_v45  ;;  %v700_v46 = vpop.f32.mrf.mxu1  ;;  %742 = vadd.xlane.f32.xlu0 %v741_v41  ;;  %v735_v47 = vmul.f32 %v891_v19, %v723_v36 }
 0x1ff   : > { %v725_v48 = vmax.f32 %v717_v43, 0.0  ;;  %v720_v49 = vadd.f32 %v890_v11, %v706_v44  ;;  %v701_v50 = vadd.f32 %v700_v46, %v571_v9  ;;  %v738_v51 = vmul.f32 %v891_v19, %v726_v42 }
 0x200   : > { %v747_v54 = vsel %vm354_vm2, %v735_v47, 0.0 }
 0x201   : > { %v728_v52 = vmax.f32 %v720_v49, 0.0  ;;  %v719_v53 = vadd.f32 %v890_v11, %v701_v50  ;;  %v737_v55 = vmul.f32 %v891_v19, %v725_v48  ;;  %v756_v58 = vsel %vm354_vm2, %v738_v51, 0.0 }
 0x202   : > { %748 = vadd.xlane.f32.xlu1 %v747_v54 }
 0x203   : > { %v727_v56 = vmax.f32 %v719_v53, 0.0  ;;  %v753_v57 = vsel %vm354_vm2, %v737_v55, 0.0  ;;  %v740_v60 = vmul.f32 %v891_v19, %v728_v52 }
 0x204   : > { %754 = vadd.xlane.f32.xlu0 %v753_v57 }
 0x205   : > { %v739_v59 = vmul.f32 %v891_v19, %v727_v56  ;;  %v762_v62 = vsel %vm354_vm2, %v740_v60, 0.0 }
 0x206   : > { %757 = vadd.xlane.f32.xlu1 %v756_v58 }
 0x207   : > { %v759_v61 = vsel %vm354_vm2, %v739_v59, 0.0 }
 0x208   : > { %760 = vadd.xlane.f32.xlu0 %v759_v61 }
 0x20a   : > { %763 = vadd.xlane.f32.xlu1 %v762_v62 }
 0x283   : > { %v746_v0 = vpop.xlane.xlu0 %745 }
 0x284   : > { %v770_v1 = vadd.f32 %v892_v63, %v746_v0 }
 0x286   : > { %779 = vst.msk [vmem:[%s190_s24 + $0x8] sm:$0xff] %vm777_vm3, %v770_v1 }
 0x287   : > { %v752_v2 = vpop.xlane.xlu1 %751  ;;  %v743_v3 = vpop.xlane.xlu0 %742 }
 0x288   : > { %v772_v4 = vadd.f32 %v892_v63, %v752_v2  ;;  %v769_v5 = vadd.f32 %v892_v63, %v743_v3 }
 0x28a   : > { %781 = vst.msk [vmem:[%s190_s24 + $0x18] sm:$0xff] %vm777_vm3, %v772_v4  ;;  %778 = vst.msk [vmem:[%s190_s24] sm:$0xff] %vm777_vm3, %v769_v5 }
 0x28b   : > { %v749_v6 = vpop.xlane.xlu1 %748 }
 0x28c   : > { %v771_v7 = vadd.f32 %v892_v63, %v749_v6 }
 0x28d   : > { %v755_v8 = vpop.xlane.xlu0 %754 }
 0x28e   : > { %780 = vst.msk [vmem:[%s190_s24 + $0x10] sm:$0xff] %vm777_vm3, %v771_v7  ;;  %v773_v9 = vadd.f32 %v892_v63, %v755_v8 }
 0x28f   : > { %v758_v10 = vpop.xlane.xlu1 %757 }
 0x290   : > { %782 = vst.msk [vmem:[%s190_s24 + $0x20] sm:$0xff] %vm777_vm3, %v773_v9  ;;  %v774_v11 = vadd.f32 %v892_v63, %v758_v10 }
 0x291   : > { %v761_v12 = vpop.xlane.xlu0 %760 }
 0x292   : > { %783 = vst.msk [vmem:[%s190_s24 + $0x28] sm:$0xff] %vm777_vm3, %v774_v11  ;;  %v775_v13 = vadd.f32 %v892_v63, %v761_v12 }
 0x293   : > { %v764_v14 = vpop.xlane.xlu1 %763 }
 0x294   : > { %784 = vst.msk [vmem:[%s190_s24 + $0x30] sm:$0xff] %vm777_vm3, %v775_v13  ;;  %v776_v15 = vadd.f32 %v892_v63, %v764_v14 }
 0x296   : > { %785 = vst.msk [vmem:[%s190_s24 + $0x38] sm:$0xff] %vm777_vm3, %v776_v15 }
 0x297 PF: > { %s13_s12 = sadd.s32 1, %s997_s12  }
 0x298   : > { %p10_p4 = scmp.ge.s32.totalorder %s13_s12, 4  }
 0x29a   :  { %12 = sbr.rel (!%p10_p4) target bundleno = 1 (0x1), region = 65 }

</bundles_post_ra>
